<compile_context>
chip_gen: v5e
topology: v5e:2x2
jax: 0.10.0
libtpu: 0.0.40
codegen_flags: <defaults>
</compile_context>

<pallas_src>
import functools

import jax
import jax.numpy as jnp
from jax import lax
from jax.experimental import pallas as pl
from jax.experimental.pallas import tpu as pltpu

_NUM_CORES = 2  # v7x has 2 TensorCores/chip; a size-2 parallel axis is
                # harmless (runs sequentially) on single-core v5e / v6e.


def _infonce_kernel(zt_ref, zh_ref, loss_ref, acc_ref, loss_scr, acc_scr, *,
                    tk, bs, z_dim, k_total, steps_per_core):
    """One grid step = one chunk of `tk` k-slices for one core.

    zt_ref / zh_ref : (tk, bs, z_dim) blocks of z_true / z_hat (input dtype).
    loss_ref/acc_ref: (1, 1, 1) f32 per-core partial sums, written in the
                      i == last epilogue only.
    loss_scr/acc_scr: (1, 1) f32 VMEM accumulators (persist across grid steps).
    """
    c = pl.program_id(0)   # core split of the k axis ("parallel")
    i = pl.program_id(1)   # chunk index within this core ("arbitrary")

    @pl.when(i == 0)
    def _init():
        loss_scr[...] = jnp.zeros_like(loss_scr)
        acc_scr[...] = jnp.zeros_like(acc_scr)

    # Valid k-slices in this chunk (the trailing chunk of a ragged / padded k
    # axis may be partially or entirely padding).
    chunk_base = (c * steps_per_core + i) * tk
    n_valid = jnp.clip(k_total - chunk_base, 0, tk)

    # Hoisted iotas (JAX does not CSE broadcast_in_dim inside the loop body).
    sub_idx = lax.broadcasted_iota(jnp.int32, (bs, bs), 0)    # row index r
    lane_pos = lax.broadcasted_iota(jnp.int32, (1, bs), 1)    # column index c
    if z_dim > bs:
        diag_mask = lax.broadcasted_iota(jnp.int32, (bs, bs), 1) == sub_idx

    def body(t, carry):
        loss_sum, acc_sum = carry
        zt_i = zt_ref[t]   # (bs, z_dim) contiguous leading-axis view
        zh_i = zh_ref[t]   # (bs, z_dim)

        # logits[r, c] = <z_true[r], z_hat[c]>; single MXU product, f32 acc.
        logits = lax.dot_general(
            zt_i, zh_i, (((1,), (1,)), ((), ())),
            preferred_element_type=jnp.float32)                    # (bs, bs)

        # ---- cross entropy with labels = arange(bs), softmax over dim=1 ----
        m = jnp.max(logits, axis=-1, keepdims=True)                # (bs, 1)
        lse = m + jnp.log(jnp.sum(jnp.exp(logits - m),
                                  axis=-1, keepdims=True))         # (bs, 1)
        if z_dim > bs:
            # diag straight from the materialized logits (masked lane reduce).
            diag = jnp.sum(jnp.where(diag_mask, logits, 0.0),
                           axis=-1, keepdims=True)                 # (bs, 1)
        else:
            # Cheaper VPU row-dot when z_dim is small.
            diag = jnp.sum(zt_i.astype(jnp.float32) * zh_i.astype(jnp.float32),
                           axis=-1, keepdims=True)                 # (bs, 1)
        loss_sum = loss_sum + jnp.sum(lse - diag, keepdims=True)   # (1, 1)

        # ---- accuracy: first-index argmax over rows (dim 0) per column -----
        # Max/compare/min all use the same tensor, so first-index argmax
        # semantics are preserved exactly (no transposed matmul needed).
        col_max = jnp.max(logits, axis=0, keepdims=True)           # (1, bs)
        is_max = logits == col_max                                 # (bs, bs)
        first_r = jnp.min(jnp.where(is_max, sub_idx, bs),
                          axis=0, keepdims=True)                   # (1, bs)
        acc_sum = acc_sum + jnp.sum((first_r == lane_pos).astype(jnp.float32),
                                    keepdims=True)                 # (1, 1)
        return loss_sum, acc_sum

    loss_sum, acc_sum = lax.fori_loop(
        0, n_valid, body,
        (jnp.zeros((1, 1), jnp.float32), jnp.zeros((1, 1), jnp.float32)))

    loss_scr[...] += loss_sum
    acc_scr[...] += acc_sum

    @pl.when(i == pl.num_programs(1) - 1)
    def _fini():
        loss_ref[...] = loss_scr[...].reshape(1, 1, 1)
        acc_ref[...] = acc_scr[...].reshape(1, 1, 1)


def _vmem_params():
    """(input-block budget bytes, vmem_limit_bytes ceiling) per generation."""
    kind = ""
    try:
        kind = jax.devices()[0].device_kind.lower()
    except Exception:  # pragma: no cover - defensive, keep conservative.
        pass
    if "v5 lite" in kind or "v5e" in kind or "v5lite" in kind:
        return 12 << 20, 56 << 20          # v5e: small scoped default
    if "v7" in kind:
        return 20 << 20, 44 << 20          # v7x: only 64 MiB physical VMEM
    if "v6" in kind or "trillium" in kind:
        return 32 << 20, 96 << 20          # v6e: 128 MiB physical VMEM
    return 12 << 20, 44 << 20              # unknown: be conservative


def _choose_tk(k, bs, z_dim, itemsize, budget_bytes):
    """Largest k-fold factor whose double-buffered input blocks fit budget."""
    bytes_per_slice = 2 * 2 * bs * z_dim * itemsize  # 2 inputs x 2 pipeline bufs
    cap = max(1, int(budget_bytes) // max(int(bytes_per_slice), 1))
    return max(1, min(k, cap))


@functools.partial(jax.jit, static_argnames=("block_k",))
def infonce_pallas(z_hat, z_true, block_k=None):
    bs, k, z_dim = z_true.shape
    assert z_hat.shape == (bs, k, z_dim)
    itemsize = jnp.dtype(z_true.dtype).itemsize

    budget, vmem_ceiling = _vmem_params()
    tk = block_k if block_k is not None else _choose_tk(k, bs, z_dim, itemsize, budget)
    tk = max(1, min(int(tk), k))

    steps_total = -(-k // tk)                               # cdiv(k, tk)
    num_par = _NUM_CORES if steps_total >= _NUM_CORES else 1
    steps_per_core = -(-steps_total // num_par)             # cdiv
    k_pad = num_par * steps_per_core * tk

    # (bs, k, z_dim) -> (k, bs, z_dim): one XLA pass per input so every
    # in-kernel k-slice read is a contiguous leading-axis view instead of a
    # sublane-strided gather.  TODO(synk): if the producer can emit
    # (k, bs, z_dim) directly, this transpose (and its HBM pass) disappears.
    zt = jnp.transpose(z_true, (1, 0, 2))
    zh = jnp.transpose(z_hat, (1, 0, 2))
    if k_pad != k:
        pad = ((0, k_pad - k), (0, 0), (0, 0))
        zt = jnp.pad(zt, pad)
        zh = jnp.pad(zh, pad)

    in_buf_bytes = 2 * 2 * tk * bs * z_dim * itemsize       # 2 inputs x 2 bufs
    vmem_limit = int(min(vmem_ceiling, in_buf_bytes + (16 << 20)))

    kernel = functools.partial(
        _infonce_kernel, tk=tk, bs=bs, z_dim=z_dim, k_total=k,
        steps_per_core=steps_per_core)

    in_map = lambda c, i: (c * steps_per_core + i, 0, 0)
    out_map = lambda c, i: (c, 0, 0)

    part_loss, part_acc = pl.pallas_call(
        kernel,
        out_shape=(
            jax.ShapeDtypeStruct((num_par, 1, 1), jnp.float32),
            jax.ShapeDtypeStruct((num_par, 1, 1), jnp.float32),
        ),
        grid_spec=pltpu.PrefetchScalarGridSpec(
            num_scalar_prefetch=0,
            grid=(num_par, steps_per_core),
            in_specs=[
                pl.BlockSpec((tk, bs, z_dim), in_map),
                pl.BlockSpec((tk, bs, z_dim), in_map),
            ],
            out_specs=[
                pl.BlockSpec((1, 1, 1), out_map),
                pl.BlockSpec((1, 1, 1), out_map),
            ],
            scratch_shapes=[
                pltpu.VMEM((1, 1), jnp.float32),
                pltpu.VMEM((1, 1), jnp.float32),
            ],
        ),
        compiler_params=pltpu.CompilerParams(
            # Core-split axis is parallel (v7x megacore); the per-core chunk
            # axis is a reduction into the scratch accumulators.
            dimension_semantics=("parallel", "arbitrary"),
            vmem_limit_bytes=vmem_limit,
        ),
    )(zt, zh)

    denom = float(bs * k)
    return dict(loss=jnp.sum(part_loss) / denom,
                acc=jnp.sum(part_acc) / denom)


def infonce_ref(z_hat, z_true):
    """Pure-JAX reference mirroring the PyTorch forward.

    The positive-pair term equals diag(logits) (PyTorch's gathered logit);
    the z_dim<=bs branch mirrors the kernel's cheaper-but-equal summation path
    so the f32 comparison stays tight.
    """
    bs, k, z_dim = z_true.shape
    labels = jnp.arange(bs)
    loss = 0.0
    acc = 0.0
    for i in range(k):
        logits = z_true[:, i, :] @ z_hat[:, i, :].T
        lse = jax.scipy.special.logsumexp(logits, axis=1)
        if z_dim > bs:
            diag = jnp.diagonal(logits)
        else:
            diag = jnp.sum(z_true[:, i, :] * z_hat[:, i, :], axis=-1)
        loss = loss + jnp.mean(lse - diag)
        y_pred = jnp.argmax(logits, axis=0)  # softmax(dim=0) is monotone
        acc = acc + jnp.sum(y_pred == labels)
    return loss / k, acc / (bs * k)


if __name__ == "__main__":
    key = jax.random.PRNGKey(0)
    k1, k2, k3, k4 = jax.random.split(key, 4)

    # Case 1: small shapes consistent with the module; z_dim > bs path,
    # single-chunk grid.
    bs, k, z_dim = 8, 4, 32
    z_hat = jax.random.normal(k1, (bs, k, z_dim), dtype=jnp.float32)
    z_true = jax.random.normal(k2, (bs, k, z_dim), dtype=jnp.float32)
    out = infonce_pallas(z_hat, z_true)
    jax.block_until_ready(out)
    ref_loss, ref_acc = infonce_ref(z_hat, z_true)
    assert jnp.allclose(out["loss"], ref_loss, rtol=1e-4, atol=1e-4), (out["loss"], ref_loss)
    assert jnp.allclose(out["acc"], ref_acc, rtol=1e-6, atol=1e-6), (out["acc"], ref_acc)

    # Case 2: ragged k with a forced small chunk exercises the two-core split,
    # the k padding, the dynamic fori_loop trip count and the z_dim <= bs path.
    bs2, k2_, z2 = 16, 7, 8
    zh2 = jax.random.normal(k3, (bs2, k2_, z2), dtype=jnp.float32)
    zt2 = jax.random.normal(k4, (bs2, k2_, z2), dtype=jnp.float32)
    out2 = infonce_pallas(zh2, zt2, block_k=2)
    jax.block_until_ready(out2)
    ref_loss2, ref_acc2 = infonce_ref(zh2, zt2)
    assert jnp.allclose(out2["loss"], ref_loss2, rtol=1e-4, atol=1e-4), (out2["loss"], ref_loss2)
    assert jnp.allclose(out2["acc"], ref_acc2, rtol=1e-6, atol=1e-6), (out2["acc"], ref_acc2)

    print("KERNEL_OK")
</pallas_src>

<mosaic_0001>
module attributes {stable_mosaic.version = 11 : i64} {
  func.func @_infonce_kernel(%arg0: i32, %arg1: i32, %arg2: memref<4x8x32xf32, #tpu.memory_space<vmem>>, %arg3: memref<4x8x32xf32, #tpu.memory_space<vmem>>, %arg4: memref<1x1x1xf32, #tpu.memory_space<vmem>>, %arg5: memref<1x1x1xf32, #tpu.memory_space<vmem>>, %arg6: memref<1x1xf32, #tpu.memory_space<vmem>>, %arg7: memref<1x1xf32, #tpu.memory_space<vmem>>) attributes {dimension_semantics = [#tpu.dimension_semantics<parallel>, #tpu.dimension_semantics<arbitrary>], iteration_bounds = array<i64: 1, 1>, scalar_prefetch = 0 : i64, scratch_operands = 2 : i64, tpu.core_type = #tpu.core_type<tc>, window_params = [{transform_indices = @transform_0, window_bounds = array<i64: 4, 8, 32>}, {transform_indices = @transform_1, window_bounds = array<i64: 4, 8, 32>}, {transform_indices = @transform_2, window_bounds = array<i64: 1, 1, 1>}, {transform_indices = @transform_3, window_bounds = array<i64: 1, 1, 1>}]} {
    %c0_i32 = arith.constant 0 : i32
    %0 = arith.cmpi eq, %arg1, %c0_i32 : i32
    %1 = arith.extui %0 : i1 to i32
    %c0_i32_0 = arith.constant 0 : i32
    %2 = arith.cmpi ne, %1, %c0_i32_0 : i32
    scf.if %2 {
      %cst_16 = arith.constant 0.000000e+00 : f32
      %27 = vector.broadcast %cst_16 : f32 to vector<1x1xf32>
      %c0_17 = arith.constant 0 : index
      %c0_18 = arith.constant 0 : index
      %28 = vector.load %arg6[%c0_17, %c0_18] : memref<1x1xf32, #tpu.memory_space<vmem>>, vector<1x1xf32>
      tpu.vector_store %arg6[%c0_17, %c0_18], %27 {strides = array<i32>} : memref<1x1xf32, #tpu.memory_space<vmem>>, vector<1x1xf32>,
      %cst_19 = arith.constant 0.000000e+00 : f32
      %29 = vector.broadcast %cst_19 : f32 to vector<1x1xf32>
      %c0_20 = arith.constant 0 : index
      %c0_21 = arith.constant 0 : index
      %30 = vector.load %arg7[%c0_20, %c0_21] : memref<1x1xf32, #tpu.memory_space<vmem>>, vector<1x1xf32>
      tpu.vector_store %arg7[%c0_20, %c0_21], %29 {strides = array<i32>} : memref<1x1xf32, #tpu.memory_space<vmem>>, vector<1x1xf32>,
    } else {
    }
    %c1_i32 = arith.constant 1 : i32
    %3 = arith.muli %arg0, %c1_i32 : i32
    %4 = arith.addi %3, %arg1 : i32
    %c4_i32 = arith.constant 4 : i32
    %5 = arith.muli %4, %c4_i32 : i32
    %c4_i32_1 = arith.constant 4 : i32
    %6 = arith.subi %c4_i32_1, %5 : i32
    %c0_i32_2 = arith.constant 0 : i32
    %c4_i32_3 = arith.constant 4 : i32
    %7 = arith.maxsi %c0_i32_2, %6 : i32
    %8 = arith.minsi %c4_i32_3, %7 : i32
    %9 = tpu.iota {dimensions = array<i32: 0>} : vector<8x8xi32>
    %10 = tpu.iota {dimensions = array<i32: 1>} : vector<1x8xi32>
    %11 = tpu.iota {dimensions = array<i32: 1>} : vector<8x8xi32>
    %12 = arith.cmpi eq, %11, %9 : vector<8x8xi32>
    %cst = arith.constant 0.000000e+00 : f32
    %13 = vector.broadcast %cst : f32 to vector<1x1xf32>
    %cst_4 = arith.constant 0.000000e+00 : f32
    %14 = vector.broadcast %cst_4 : f32 to vector<1x1xf32>
    %c0_i32_5 = arith.constant 0 : i32
    %15 = arith.subi %8, %c0_i32_5 : i32
    %16 = arith.addi %c0_i32_5, %15 : i32
    %c1_i32_6 = arith.constant 1 : i32
    %17:2 = scf.for %arg8 = %c0_i32_5 to %16 step %c1_i32_6 iter_args(%arg9 = %13, %arg10 = %14) -> (vector<1x1xf32>, vector<1x1xf32>)  : i32 {
      %27 = arith.index_cast %arg8 : i32 to index
      %c0_16 = arith.constant 0 : index
      %c0_17 = arith.constant 0 : index
      %28 = vector.load %arg2[%27, %c0_16, %c0_17] : memref<4x8x32xf32, #tpu.memory_space<vmem>>, vector<1x8x32xf32>
      %29 = vector.shape_cast %28 : vector<1x8x32xf32> to vector<8x32xf32>
      %30 = arith.index_cast %arg8 : i32 to index
      %c0_18 = arith.constant 0 : index
      %c0_19 = arith.constant 0 : index
      %31 = vector.load %arg3[%30, %c0_18, %c0_19] : memref<4x8x32xf32, #tpu.memory_space<vmem>>, vector<1x8x32xf32>
      %32 = vector.shape_cast %31 : vector<1x8x32xf32> to vector<8x32xf32>
      %cst_20 = arith.constant dense<0.000000e+00> : vector<8x8xf32>
      %33 = tpu.matmul %29, %32, %cst_20 {dimension_numbers = #tpu.dot_dimension_numbers<[1], [1], [0], [0], [0, 0, 1, 0], [], []>} : vector<8x32xf32>, vector<8x32xf32>, vector<8x8xf32> -> vector<8x8xf32>
      %cst_21 = arith.constant dense<0xFF800000> : vector<8xf32>
      %34 = vector.multi_reduction <maximumf>, %33, %cst_21 [1] : vector<8x8xf32> to vector<8xf32>
      %35 = vector.shape_cast %34 : vector<8xf32> to vector<8x1xf32>
      %36 = vector.broadcast %35 : vector<8x1xf32> to vector<8x8xf32>
      %37 = arith.subf %33, %36 : vector<8x8xf32>
      %38 = math.exp %37 : vector<8x8xf32>
      %cst_22 = arith.constant dense<0.000000e+00> : vector<8xf32>
      %39 = vector.multi_reduction <add>, %38, %cst_22 [1] : vector<8x8xf32> to vector<8xf32>
      %40 = vector.shape_cast %39 : vector<8xf32> to vector<8x1xf32>
      %41 = math.log %40 : vector<8x1xf32>
      %42 = arith.addf %35, %41 : vector<8x1xf32>
      %cst_23 = arith.constant 0.000000e+00 : f32
      %43 = vector.broadcast %cst_23 : f32 to vector<8x8xf32>
      %44 = arith.select %12, %33, %43 : vector<8x8xi1>, vector<8x8xf32>
      %cst_24 = arith.constant dense<0.000000e+00> : vector<8xf32>
      %45 = vector.multi_reduction <add>, %44, %cst_24 [1] : vector<8x8xf32> to vector<8xf32>
      %46 = vector.shape_cast %45 : vector<8xf32> to vector<8x1xf32>
      %47 = arith.subf %42, %46 : vector<8x1xf32>
      %48 = vector.shape_cast %47 : vector<8x1xf32> to vector<1x8x1xf32>
      %cst_25 = arith.constant dense<0.000000e+00> : vector<1xf32>
      %49 = vector.multi_reduction <add>, %48, %cst_25 [1, 2] : vector<1x8x1xf32> to vector<1xf32>
      %50 = vector.shape_cast %49 : vector<1xf32> to vector<1x1x1xf32>
      %51 = vector.extract %50[0, 0, 0] : f32 from vector<1x1x1xf32>
      %52 = vector.broadcast %51 : f32 to vector<1x1xf32>
      %53 = arith.addf %arg9, %52 : vector<1x1xf32>
      %cst_26 = arith.constant dense<0xFF800000> : vector<8xf32>
      %54 = vector.multi_reduction <maximumf>, %33, %cst_26 [0] : vector<8x8xf32> to vector<8xf32>
      %55 = vector.shape_cast %54 : vector<8xf32> to vector<1x8xf32>
      %56 = vector.broadcast %55 : vector<1x8xf32> to vector<8x8xf32>
      %57 = arith.cmpf oeq, %33, %56 : vector<8x8xf32>
      %c8_i32 = arith.constant 8 : i32
      %58 = vector.broadcast %c8_i32 : i32 to vector<8x8xi32>
      %59 = arith.select %57, %9, %58 : vector<8x8xi1>, vector<8x8xi32>
      %cst_27 = arith.constant dense<2147483647> : vector<8xi32>
      %60 = vector.multi_reduction <minsi>, %59, %cst_27 [0] : vector<8x8xi32> to vector<8xi32>
      %61 = vector.shape_cast %60 : vector<8xi32> to vector<1x8xi32>
      %62 = arith.cmpi eq, %61, %10 : vector<1x8xi32>
      %63 = arith.extui %62 : vector<1x8xi1> to vector<1x8xi32>
      %64 = arith.sitofp %63 : vector<1x8xi32> to vector<1x8xf32>
      %65 = vector.shape_cast %64 : vector<1x8xf32> to vector<1x1x8xf32>
      %cst_28 = arith.constant dense<0.000000e+00> : vector<1xf32>
      %66 = vector.multi_reduction <add>, %65, %cst_28 [1, 2] : vector<1x1x8xf32> to vector<1xf32>
      %67 = vector.shape_cast %66 : vector<1xf32> to vector<1x1x1xf32>
      %68 = vector.extract %67[0, 0, 0] : f32 from vector<1x1x1xf32>
      %69 = vector.broadcast %68 : f32 to vector<1x1xf32>
      %70 = arith.addf %arg10, %69 : vector<1x1xf32>
      scf.yield %53, %70 : vector<1x1xf32>, vector<1x1xf32>
    }
    %c0 = arith.constant 0 : index
    %c0_7 = arith.constant 0 : index
    %18 = vector.load %arg6[%c0, %c0_7] : memref<1x1xf32, #tpu.memory_space<vmem>>, vector<1x1xf32>
    %19 = arith.addf %18, %17#0 : vector<1x1xf32>
    %c0_8 = arith.constant 0 : index
    %c0_9 = arith.constant 0 : index
    %20 = vector.load %arg6[%c0_8, %c0_9] : memref<1x1xf32, #tpu.memory_space<vmem>>, vector<1x1xf32>
    tpu.vector_store %arg6[%c0_8, %c0_9], %19 {strides = array<i32>} : memref<1x1xf32, #tpu.memory_space<vmem>>, vector<1x1xf32>,
    %c0_10 = arith.constant 0 : index
    %c0_11 = arith.constant 0 : index
    %21 = vector.load %arg7[%c0_10, %c0_11] : memref<1x1xf32, #tpu.memory_space<vmem>>, vector<1x1xf32>
    %22 = arith.addf %21, %17#1 : vector<1x1xf32>
    %c0_12 = arith.constant 0 : index
    %c0_13 = arith.constant 0 : index
    %23 = vector.load %arg7[%c0_12, %c0_13] : memref<1x1xf32, #tpu.memory_space<vmem>>, vector<1x1xf32>
    tpu.vector_store %arg7[%c0_12, %c0_13], %22 {strides = array<i32>} : memref<1x1xf32, #tpu.memory_space<vmem>>, vector<1x1xf32>,
    %c0_i32_14 = arith.constant 0 : i32
    %24 = arith.cmpi eq, %arg1, %c0_i32_14 : i32
    %25 = arith.extui %24 : i1 to i32
    %c0_i32_15 = arith.constant 0 : i32
    %26 = arith.cmpi ne, %25, %c0_i32_15 : i32
    scf.if %26 {
      %c0_16 = arith.constant 0 : index
      %c0_17 = arith.constant 0 : index
      %27 = vector.load %arg6[%c0_16, %c0_17] : memref<1x1xf32, #tpu.memory_space<vmem>>, vector<1x1xf32>
      %28 = vector.shape_cast %27 : vector<1x1xf32> to vector<1x1x1xf32>
      %c0_18 = arith.constant 0 : index
      %c0_19 = arith.constant 0 : index
      %c0_20 = arith.constant 0 : index
      %29 = vector.load %arg4[%c0_18, %c0_19, %c0_20] : memref<1x1x1xf32, #tpu.memory_space<vmem>>, vector<1x1x1xf32>
      tpu.vector_store %arg4[%c0_18, %c0_19, %c0_20], %28 {strides = array<i32>} : memref<1x1x1xf32, #tpu.memory_space<vmem>>, vector<1x1x1xf32>,
      %c0_21 = arith.constant 0 : index
      %c0_22 = arith.constant 0 : index
      %30 = vector.load %arg7[%c0_21, %c0_22] : memref<1x1xf32, #tpu.memory_space<vmem>>, vector<1x1xf32>
      %31 = vector.shape_cast %30 : vector<1x1xf32> to vector<1x1x1xf32>
      %c0_23 = arith.constant 0 : index
      %c0_24 = arith.constant 0 : index
      %c0_25 = arith.constant 0 : index
      %32 = vector.load %arg5[%c0_23, %c0_24, %c0_25] : memref<1x1x1xf32, #tpu.memory_space<vmem>>, vector<1x1x1xf32>
      tpu.vector_store %arg5[%c0_23, %c0_24, %c0_25], %31 {strides = array<i32>} : memref<1x1x1xf32, #tpu.memory_space<vmem>>, vector<1x1x1xf32>,
    } else {
    }
    return
  }
  func.func @transform_0(%arg0: i32, %arg1: i32) -> (i32, i32, i32) {
    %c1_i32 = arith.constant 1 : i32
    %0 = arith.muli %arg0, %c1_i32 : i32
    %1 = arith.addi %0, %arg1 : i32
    %c0_i32 = arith.constant 0 : i32
    %c0_i32_0 = arith.constant 0 : i32
    %c0_i32_1 = arith.constant 0 : i32
    return %1, %c0_i32, %c0_i32_0 : i32, i32, i32
  }
  func.func @transform_1(%arg0: i32, %arg1: i32) -> (i32, i32, i32) {
    %c1_i32 = arith.constant 1 : i32
    %0 = arith.muli %arg0, %c1_i32 : i32
    %1 = arith.addi %0, %arg1 : i32
    %c0_i32 = arith.constant 0 : i32
    %c0_i32_0 = arith.constant 0 : i32
    %c0_i32_1 = arith.constant 0 : i32
    return %1, %c0_i32, %c0_i32_0 : i32, i32, i32
  }
  func.func @transform_2(%arg0: i32, %arg1: i32) -> (i32, i32, i32) {
    %c0_i32 = arith.constant 0 : i32
    %c0_i32_0 = arith.constant 0 : i32
    %c0_i32_1 = arith.constant 0 : i32
    return %arg0, %c0_i32, %c0_i32_0 : i32, i32, i32
  }
  func.func @transform_3(%arg0: i32, %arg1: i32) -> (i32, i32, i32) {
    %c0_i32 = arith.constant 0 : i32
    %c0_i32_0 = arith.constant 0 : i32
    %c0_i32_1 = arith.constant 0 : i32
    return %arg0, %c0_i32, %c0_i32_0 : i32, i32, i32
  }
}

</mosaic_0001>

<bundles_post_ra>
// kernel: infonce_pallas.1
= control target key start
LH: loop header
LB: loop body
LE: loop exit
PB: predicated region body
PF: predicated region fallthrough
CT: control target
= control target key end

     0   :  { %9 = vsyncpa [#allocation5], 0  ;;  %s454_s0 = inlined_call_operand.vmem [shape: f32[4,8,32], index: 0, kind: input, shape index: {}]   ;;  %s455_s1 = inlined_call_operand.vmem [shape: f32[4,8,32], index: 1, kind: input, shape index: {}]   ;;  %s456_s2 = inlined_call_operand.hbm [shape: f32[1,1,1], index: 2, kind: output, shape index: {0}]   ;;  %s457_s3 = inlined_call_operand.hbm [shape: f32[1,1,1], index: 3, kind: output, shape index: {1}]  }
   0x1   :  { %10 = vsyncpa [#allocation7], 0  ;;  %vm63_vm0 = vcmask 0   ;;  %v73_v0 = vlaneseq  ;;  %v372_v1 = vmov 0.0   ;;  %v404_v4 = vmov 0.0   ;;  %s408_s12 = smov 0  }
   0x2   :  { %64 = vst.msk [vmem:[#allocation2] sm:$0x1] %vm63_vm0, %v372_v1  ;;  %v406_v5 = vmov 0.0  }
   0x3   :  { %65 = vst.msk [vmem:[#allocation3] sm:$0x1] %vm63_vm0, %v372_v1  ;;  %v398_v2 = vshrl.u32 %v73_v0, 7  ;;  %v400_v3 = vand.u32 127, %v73_v0 }
   0x5   :  { %vm77_vm1 = vcmp.eq.s32.totalorder %v400_v3, %v398_v2 }
   0x6 LB: > { %s256_s13 = sshll.u32 %s370_s12, 3  ;;  %vm91_vm2 = vcmask 261120   ;;  %vm118_vm3 = vcmask 64512   ;;  %vm170_vm8 = vcmask 57344   ;;  %v373_v26 = vmov 0.0   ;;  %s81_s12 = sadd.s32 1, %s370_s12   ;;  %s370_s12 = sphi %s408_s12, %s81_s12   ;;  %v366_v5 = vphi %v406_v5, %v459_v5   ;;  %v362_v4 = vphi %v404_v4, %v458_v4  }
   0x7   : > { %s89_s16 = scalar_lea.vmem %s455_s1, %s256_s13  ;;  %s87_s19 = scalar_lea.vmem %s454_s0, %s256_s13  ;;  %vm136_vm10 = vcmask 7168  }
   0x8   : > { %v90_v6 = vld [vmem:[%s89_s16] sm:$0xff]  ;;  %p80_p0 = scmp.ge.s32.totalorder %s81_s12, 4 }
   0x9   : > { %257 = vmatpush.xpose.msk.msra.mxu0 %vm91_vm2, %v90_v6  ;;  %v88_v7 = vld [vmem:[%s87_s19] sm:$0xff]  ;;  %s374_s22 = smov (%p80_p0), [#allocation4]   ;;  %s204_s26 = sshll.u32 (%p80_p0), %s456_s2, 4  ;;  %s205_s26 = int_to_ptr.hbm [resolvable:$true] %s204_s26 }
   0xa   :  { %v183_v59 = vld [vmem:[#allocation2] sm:$0x1] (%p80_p0)  ;;  %v187_v60 = vld [vmem:[#allocation3] sm:$0x1] (%p80_p0)  ;;  %s202_s23 = sshll.u32 (%p80_p0), %s374_s22, 4  ;;  %s375_s27 = smov (%p80_p0), [#allocation6]   ;;  %s203_s23 = int_to_ptr.vmem [resolvable:$true] %s202_s23 }
   0xb   :  { %s213_s28 = sshll.u32 (%p80_p0), %s375_s27, 4  ;;  %s215_s4 = sshll.u32 (%p80_p0), %s457_s3, 4  ;;  %s214_s28 = int_to_ptr.vmem [resolvable:$true] %s213_s28  ;;  %s216_s4 = int_to_ptr.hbm [resolvable:$true] %s215_s4 }
   0xc   : > { %258 = vmatmul.msk.f32.vlgmr.msra.gmra.mxu0 %vm91_vm2, %v88_v7 }
  0x89   : > { %v115_v8 = vpop.f32.mrf.mxu0 }
  0x8a   : > { %v119_v9 = vsel %vm118_vm3, %v115_v8, -inf  ;;  %v131_v10 = vsel %vm77_vm1, %v115_v8, 0.0 }
  0x8b   : > { %120 = vmax.xlane.f32.xlu0 %v119_v9  ;;  %v149_v11 = vrot.slane %v119_v9, 4  ;;  %v132_v12 = vsel %vm118_vm3, %v131_v10, 0.0 }
  0x8c   : > { %133 = vadd.xlane.f32.xlu1 %v132_v12 }
  0x8d   : > { %v150_v13 = vmax.f32 %v119_v9, %v149_v11 }
  0x8f   : > { %v151_v14 = vrot.slane %v150_v13, 2 }
  0x91   : > { %v152_v15 = vmax.f32 %v150_v13, %v151_v14 }
  0x93   : > { %v153_v16 = vrot.slane %v152_v15, 1 }
  0x95   : > { %v154_v17 = vmax.f32 %v152_v15, %v153_v16 }
  0x97   : > { %vm155_vm4 = vcmp.eq.f32.partialorder %v115_v8, %v154_v17 }
  0x98   : > { %v156_v18 = vsel %vm155_vm4, %v398_v2, 8 }
  0x99   : > { %v157_v19 = vsel %vm118_vm3, %v156_v18, 2147483647 }
  0x9a   : > { %v158_v20 = vrot.slane %v157_v19, 4 }
  0x9c   : > { %vm159_vm5 = vcmp.lt.s32.totalorder %v157_v19, %v158_v20 }
  0x9d   : > { %v160_v21 = vsel %vm159_vm5, %v157_v19, %v158_v20 }
  0x9e   : > { %v161_v22 = vrot.slane %v160_v21, 2 }
  0xa0   : > { %vm162_vm6 = vcmp.lt.s32.totalorder %v160_v21, %v161_v22 }
  0xa1   : > { %v163_v23 = vsel %vm162_vm6, %v160_v21, %v161_v22 }
  0xa2   : > { %v164_v24 = vrot.slane %v163_v23, 1 }
  0xa4   : > { %vm165_vm7 = vcmp.lt.s32.totalorder %v163_v23, %v164_v24 }
  0xa5   : > { %v166_v25 = vsel %vm165_vm7, %v163_v23, %v164_v24 }
  0xa6   : > { %vm167_vm9 = vcmp.eq.s32.totalorder %v166_v25, %v400_v3 }
  0xa7   : > { %v259_v27 = vsel %vm167_vm9, 1.0, %v373_v26 }
  0xa8   : > { %v171_v28 = vsel %vm170_vm8, %v259_v27, 0.0 }
  0xa9   : > { %172 = vadd.xlane.f32.xlu2 %v171_v28 }
  0xfe   : > { %v121_v29 = vpop.xlane.xlu0 %120 }
  0xff   : > { %v122_v30 = vsub.f32 %v115_v8, %v121_v29  ;;  %v134_v38 = vpop.xlane.xlu1 %133 }
 0x101   : > { %v123_v31 = vmul.f32 1.442695, %v122_v30 }
 0x103   : > { %292 = vpow2.f32 %v123_v31 }
 0x109   : > { %v293_v32 = vpop.eup %292 }
 0x10a   : > { %v125_v33 = vsel %vm118_vm3, %v293_v32, 0.0 }
 0x10b   : > { %126 = vadd.xlane.f32.xlu0 %v125_v33 }
 0x11c   : > { %v173_v41 = vpop.xlane.xlu2 %172 }
 0x11d   : > { %v174_v42 = vrot.slane %v173_v41, 4 }
 0x11f   : > { %v175_v43 = vadd.f32 %v174_v42, %v173_v41 }
 0x121   : > { %v176_v44 = vrot.slane %v175_v43, 2 }
 0x123   : > { %v177_v48 = vadd.f32 %v176_v44, %v175_v43 }
 0x125   : > { %v178_v51 = vrot.slane %v177_v48, 1 }
 0x127   : > { %v179_v54 = vadd.f32 %v178_v51, %v177_v48 }
 0x17e   : > { %v127_v34 = vpop.xlane.xlu0 %126 }
 0x17f   : > { %294 = vlog2.f32 %v127_v34 }
 0x185   : > { %v295_v35 = vpop.eup %294 }
 0x186   : > { %v129_v36 = vmul.f32 0.6931472, %v295_v35 }
 0x188   : > { %v130_v37 = vadd.f32 %v129_v36, %v121_v29 }
 0x18a   : > { %v135_v39 = vsub.f32 %v130_v37, %v134_v38 }
 0x18c   : > { %v137_v40 = vsel %vm136_vm10, %v135_v39, 0.0 }
 0x18d   : > { %138 = vadd.xlane.f32.xlu1 %v137_v40 }
 0x200   : > { %v139_v45 = vpop.xlane.xlu1 %138 }
 0x201   : > { %v140_v46 = vrot.slane %v139_v45, 4 }
 0x203   : > { %v141_v47 = vadd.f32 %v140_v46, %v139_v45 }
 0x205   : > { %v142_v49 = vrot.slane %v141_v47, 2 }
 0x207   : > { %v143_v50 = vadd.f32 %v142_v49, %v141_v47 }
 0x209   : > { %v144_v52 = vrot.slane %v143_v50, 1 }
 0x20b   : > { %v145_v53 = vadd.f32 %v144_v52, %v143_v50 }
 0x20d   : > { %260 = vpush %v145_v53 }
 0x20e   : > { %262 = vpush %v179_v54 }
 0x23e   : > { %s261_s20 = spop %260 }
 0x23f   : > { %v147_v55 = vstv %s261_s20  ;;  %s263_s21 = spop %262  ;;  %83 = sbr.rel (!%p80_p0) target bundleno = 6 (0x6), region = 59 }
 0x240   : > { %v148_v56 = vadd.f32 %v366_v5, %v147_v55   ;;  %v181_v57 = vstv %s263_s21 }
 0x241   : > { %v182_v58 = vadd.f32 %v362_v4, %v181_v57  }
 0x242   : > { %v459_v5 = vmov %v148_v56  ;;  %v184_v61 = vadd.f32 (%p80_p0), %v183_v59, %v148_v56 }
 0x243   : > { %v458_v4 = vmov %v182_v58  ;;  %v188_v62 = vadd.f32 (%p80_p0), %v187_v60, %v182_v58 }
 0x244   :  { %186 = vst.msk [vmem:[#allocation2] sm:$0x1] %vm63_vm0, %v184_v61 }
 0x245   :  { %189 = vst.msk [vmem:[#allocation3] sm:$0x1] %vm63_vm0, %v188_v62 }
 0x24b   :  { %v193_v63 = vld [vmem:[#allocation2] sm:$0x1] }
 0x24c   :  { %194 = vst.msk [vmem:[#allocation4] sm:$0x1] %vm63_vm0, %v193_v63  ;;  %v195_v0 = vld [vmem:[#allocation3] sm:$0x1] }
 0x24d   :  { %196 = vst.msk [vmem:[#allocation6] sm:$0x1] %vm63_vm0, %v195_v0  ;;  %207 = dma.vmem_to_hbm [thread:$0]  %s203_s23, 16, %s205_s26, [#allocation5]  }
 0x24e   :  { %218 = dma.vmem_to_hbm [thread:$0]  %s214_s28, 16, %s216_s4, [#allocation7]  }
 0x24f   :  { %356 = dma.done.wait [#allocation5], 16  }
 0x250   :  { %357 = vsyncadd [#allocation5], 4294967280 }
 0x251   :  { %358 = dma.done.wait [#allocation7], 16  }
 0x252   :  { %359 = vsyncadd [#allocation7], 4294967280 }
 0x253   :  { %227 = vsyncpa [#allocation5], 1 }
 0x254   :  { %228 = vsyncpa [#allocation7], 1 }

</bundles_post_ra>
